<compile_context>
chip_gen: v5e
topology: v5e:2x2
jax: 0.10.0
libtpu: 0.0.40
codegen_flags: <defaults>
</compile_context>

<pallas_src>
import functools
import math

import jax
import jax.numpy as jnp
import numpy as np
from jax.experimental import pallas as pl
from jax.experimental.pallas import tpu as pltpu


def _round_up(n, m):
    return ((n + m - 1) // m) * m


# --------------------------------- kernel ----------------------------------

def _add_norm_kernel(x_ref, y_ref, gb_ref, o_ref, *, eps, inv_h):
    # dropout(Y) + X  (dropout is identity here); stats in f32 regardless of
    # the streaming dtype.
    s = x_ref[...].astype(jnp.float32) + y_ref[...].astype(jnp.float32)  # (bn, H)

    # One-pass LayerNorm statistics: mean and E[x^2] in a single sweep.
    ssum = jnp.sum(s, axis=-1, keepdims=True)
    ssq = jnp.sum(s * s, axis=-1, keepdims=True)
    mean = ssum * inv_h
    # Clamp: E[x^2] - mean^2 can round slightly negative (cancellation) and the
    # masked tail rows of a partial block may contain garbage.
    var = jnp.maximum(ssq * inv_h - mean * mean, 0.0)
    inv = jax.lax.rsqrt(var + eps)                    # EUP, not a VALU divide

    gamma = gb_ref[0:1, :]                            # (1, H) f32
    beta = gb_ref[1:2, :]                             # (1, H) f32
    o_ref[...] = ((s - mean) * inv * gamma + beta).astype(o_ref.dtype)


# -------------------------------- wrapper -----------------------------------

def add_norm(x, y, gamma, beta, *, eps=1e-5,
             vmem_budget_bytes=32 * 1024 * 1024,
             vmem_limit_bytes=48 * 1024 * 1024):
    """Fused residual-add + LayerNorm over the last axis of x/y.

    Inputs stream through the kernel in their native dtype (e.g. bf16); the
    LayerNorm statistics are computed in f32 inside the kernel.
    """
    assert x.shape == y.shape, "X and Y must have the same shape"
    orig_shape = x.shape
    out_dtype = x.dtype
    H = orig_shape[-1]
    N = int(math.prod(orig_shape[:-1])) if len(orig_shape) > 1 else 1

    x2 = x.reshape(N, H)
    y2 = y.reshape(N, H)
    # Pack the two tiny affine params into ONE grid-invariant (2, H) f32 input.
    gb = jnp.stack([gamma.reshape(H), beta.reshape(H)], axis=0).astype(jnp.float32)

    elem_bytes = jnp.dtype(out_dtype).itemsize

    # Block rows from a VMEM byte budget: 2 inputs + 1 output, each
    # double-buffered => 6 (bn, H) buffers of the streaming dtype.
    bn = vmem_budget_bytes // (6 * H * elem_bytes)
    # Amortize the fixed per-grid-step overhead: aim for >= ~1 MiB per block
    # (matters at small H; never exceeds the budget at a 32 MiB budget).
    bn = max(bn, pl.cdiv(1 << 20, H * elem_bytes))
    # Keep at least 2 grid steps so both TensorCores get work on v7x.
    bn = min(bn, _round_up(pl.cdiv(N, 2), 8))
    bn = max(8, (bn // 8) * 8)

    grid = (pl.cdiv(N, bn),)   # partial last block: rows independent, OOB stores masked

    kernel = functools.partial(_add_norm_kernel, eps=eps, inv_h=1.0 / H)
    out = pl.pallas_call(
        kernel,
        out_shape=jax.ShapeDtypeStruct((N, H), out_dtype),
        grid_spec=pltpu.PrefetchScalarGridSpec(
            num_scalar_prefetch=0,
            grid=grid,
            in_specs=[
                pl.BlockSpec((bn, H), lambda i: (i, 0)),   # X rows (native dtype)
                pl.BlockSpec((bn, H), lambda i: (i, 0)),   # Y rows (native dtype)
                pl.BlockSpec((2, H), lambda i: (0, 0)),    # packed gamma/beta (invariant)
            ],
            out_specs=pl.BlockSpec((bn, H), lambda i: (i, 0)),
        ),
        compiler_params=pltpu.CompilerParams(
            dimension_semantics=("parallel",),
            vmem_limit_bytes=vmem_limit_bytes),
    )(x2, y2, gb)

    return out.reshape(orig_shape)


# ----------------------------- pure-JAX reference ---------------------------

def reference_add_norm(x, y, gamma, beta, eps=1e-5):
    s = (y + x).astype(jnp.float32)
    mean = jnp.mean(s, axis=-1, keepdims=True)
    var = jnp.mean((s - mean) ** 2, axis=-1, keepdims=True)
    out = (s - mean) / jnp.sqrt(var + eps) * gamma.astype(jnp.float32) \
        + beta.astype(jnp.float32)
    return out.astype(x.dtype)


# ----------------------------------- main ------------------------------------

if __name__ == "__main__":
    # Shapes consistent with the translation-lab transformer: (batch, seq, hidden).
    B, S, H = 2, 8, 32

    key = jax.random.PRNGKey(0)
    kx, ky, kg, kb = jax.random.split(key, 4)
    X = jax.random.normal(kx, (B, S, H), jnp.float32)
    Y = jax.random.normal(ky, (B, S, H), jnp.float32)
    gamma = 1.0 + 0.1 * jax.random.normal(kg, (H,), jnp.float32)
    beta = 0.1 * jax.random.normal(kb, (H,), jnp.float32)

    # TODO(synk): training-mode dropout (p > 0) would need in-kernel
    # pltpu.prng_* mask generation with an explicit RNG key; treated as
    # identity (eval mode / p = 0) here, matching nn.Dropout in eval.

    # f32 path
    out = add_norm(X, Y, gamma, beta)
    out = jax.block_until_ready(out)
    ref = reference_add_norm(X, Y, gamma, beta)
    assert out.shape == (B, S, H) and out.dtype == jnp.float32
    np.testing.assert_allclose(np.asarray(out), np.asarray(ref),
                               atol=1e-4, rtol=1e-4)

    # bf16 path (native-dtype streaming across the pallas_call boundary)
    Xb, Yb = X.astype(jnp.bfloat16), Y.astype(jnp.bfloat16)
    out_bf = jax.block_until_ready(add_norm(Xb, Yb, gamma, beta))
    ref_bf = reference_add_norm(Xb, Yb, gamma, beta)
    assert out_bf.dtype == jnp.bfloat16
    np.testing.assert_allclose(np.asarray(out_bf, dtype=np.float32),
                               np.asarray(ref_bf, dtype=np.float32),
                               atol=2e-2, rtol=2e-2)

    print("KERNEL_OK")
</pallas_src>

<mosaic_0001>
module attributes {stable_mosaic.version = 11 : i64} {
  func.func @_add_norm_kernel(%arg0: i32, %arg1: memref<8x32xf32, #tpu.memory_space<vmem>>, %arg2: memref<8x32xf32, #tpu.memory_space<vmem>>, %arg3: memref<2x32xf32, #tpu.memory_space<vmem>>, %arg4: memref<8x32xf32, #tpu.memory_space<vmem>>) attributes {dimension_semantics = [#tpu.dimension_semantics<parallel>], iteration_bounds = array<i64: 2>, scalar_prefetch = 0 : i64, scratch_operands = 0 : i64, tpu.core_type = #tpu.core_type<tc>, window_params = [{transform_indices = @transform_0, window_bounds = array<i64: 8, 32>}, {transform_indices = @transform_1, window_bounds = array<i64: 8, 32>}, {pipeline_mode = #tpu.pipeline_mode<synchronous>, transform_indices = @transform_2, window_bounds = array<i64: 2, 32>}, {transform_indices = @transform_3, window_bounds = array<i64: 8, 32>}]} {
    %c0 = arith.constant 0 : index
    %c0_0 = arith.constant 0 : index
    %0 = vector.load %arg1[%c0, %c0_0] : memref<8x32xf32, #tpu.memory_space<vmem>>, vector<8x32xf32>
    %c0_1 = arith.constant 0 : index
    %c0_2 = arith.constant 0 : index
    %1 = vector.load %arg2[%c0_1, %c0_2] : memref<8x32xf32, #tpu.memory_space<vmem>>, vector<8x32xf32>
    %2 = arith.addf %0, %1 : vector<8x32xf32>
    %cst = arith.constant dense<0.000000e+00> : vector<8xf32>
    %3 = vector.multi_reduction <add>, %2, %cst [1] : vector<8x32xf32> to vector<8xf32>
    %4 = vector.shape_cast %3 : vector<8xf32> to vector<8x1xf32>
    %5 = arith.mulf %2, %2 : vector<8x32xf32>
    %cst_3 = arith.constant dense<0.000000e+00> : vector<8xf32>
    %6 = vector.multi_reduction <add>, %5, %cst_3 [1] : vector<8x32xf32> to vector<8xf32>
    %7 = vector.shape_cast %6 : vector<8xf32> to vector<8x1xf32>
    %cst_4 = arith.constant 3.125000e-02 : f32
    %8 = vector.broadcast %cst_4 : f32 to vector<8x1xf32>
    %9 = arith.mulf %4, %8 : vector<8x1xf32>
    %cst_5 = arith.constant 3.125000e-02 : f32
    %10 = vector.broadcast %cst_5 : f32 to vector<8x1xf32>
    %11 = arith.mulf %7, %10 : vector<8x1xf32>
    %12 = arith.mulf %9, %9 : vector<8x1xf32>
    %13 = arith.subf %11, %12 : vector<8x1xf32>
    %cst_6 = arith.constant 0.000000e+00 : f32
    %14 = vector.broadcast %cst_6 : f32 to vector<8x1xf32>
    %15 = arith.maximumf %13, %14 : vector<8x1xf32>
    %cst_7 = arith.constant 9.99999974E-6 : f32
    %16 = vector.broadcast %cst_7 : f32 to vector<8x1xf32>
    %17 = arith.addf %15, %16 : vector<8x1xf32>
    %18 = math.rsqrt %17 : vector<8x1xf32>
    %c0_8 = arith.constant 0 : index
    %c0_9 = arith.constant 0 : index
    %19 = vector.load %arg3[%c0_8, %c0_9] : memref<2x32xf32, #tpu.memory_space<vmem>>, vector<1x32xf32>
    %c1 = arith.constant 1 : index
    %c0_10 = arith.constant 0 : index
    %20 = vector.load %arg3[%c1, %c0_10] : memref<2x32xf32, #tpu.memory_space<vmem>>, vector<1x32xf32>
    %21 = vector.broadcast %9 : vector<8x1xf32> to vector<8x32xf32>
    %22 = arith.subf %2, %21 : vector<8x32xf32>
    %23 = vector.broadcast %18 : vector<8x1xf32> to vector<8x32xf32>
    %24 = arith.mulf %22, %23 : vector<8x32xf32>
    %25 = vector.broadcast %19 : vector<1x32xf32> to vector<8x32xf32>
    %26 = arith.mulf %24, %25 : vector<8x32xf32>
    %27 = vector.broadcast %20 : vector<1x32xf32> to vector<8x32xf32>
    %28 = arith.addf %26, %27 : vector<8x32xf32>
    %c0_11 = arith.constant 0 : index
    %c0_12 = arith.constant 0 : index
    %29 = vector.load %arg4[%c0_11, %c0_12] : memref<8x32xf32, #tpu.memory_space<vmem>>, vector<8x32xf32>
    tpu.vector_store %arg4[%c0_11, %c0_12], %28 {strides = array<i32>} : memref<8x32xf32, #tpu.memory_space<vmem>>, vector<8x32xf32>,
    return
  }
  func.func @transform_0(%arg0: i32) -> (i32, i32) {
    %c0_i32 = arith.constant 0 : i32
    %c0_i32_0 = arith.constant 0 : i32
    return %arg0, %c0_i32 : i32, i32
  }
  func.func @transform_1(%arg0: i32) -> (i32, i32) {
    %c0_i32 = arith.constant 0 : i32
    %c0_i32_0 = arith.constant 0 : i32
    return %arg0, %c0_i32 : i32, i32
  }
  func.func @transform_2(%arg0: i32) -> (i32, i32) {
    %c0_i32 = arith.constant 0 : i32
    %c0_i32_0 = arith.constant 0 : i32
    %c0_i32_1 = arith.constant 0 : i32
    return %c0_i32, %c0_i32_0 : i32, i32
  }
  func.func @transform_3(%arg0: i32) -> (i32, i32) {
    %c0_i32 = arith.constant 0 : i32
    %c0_i32_0 = arith.constant 0 : i32
    return %arg0, %c0_i32 : i32, i32
  }
}

</mosaic_0001>

<bundles_post_ra>
// kernel: tpu_custom_call.1
= control target key start
LH: loop header
LB: loop body
LE: loop exit
PB: predicated region body
PF: predicated region fallthrough
CT: control target
= control target key end

     0   :  { %s836_s0 = inlined_call_operand.hbm [shape: f32[16,32], index: 0, kind: input, shape index: {}]   ;;  %s837_s1 = inlined_call_operand.hbm [shape: f32[16,32], index: 1, kind: input, shape index: {}]   ;;  %s838_s2 = inlined_call_operand.hbm [shape: f32[2,32], index: 2, kind: input, shape index: {}]   ;;  %s839_s3 = inlined_call_operand.hbm [shape: f32[16,32], index: 3, kind: output, shape index: {}]  }
   0x1   :  { %840 = sst [smem:[#allocation14_spill]] %s838_s2 }
   0x2   :  { %8 = vsyncpa [#allocation3], 0 }
   0x3   :  { %10 = vsyncpa [#allocation3 + $0x1], 0 }
   0x4   :  { %11 = vsyncpa [#allocation6], 0 }
   0x5   :  { %13 = vsyncpa [#allocation6 + $0x1], 0 }
   0x6   :  { %14 = vsyncpa [#allocation4], 0 }
   0x7   :  { %16 = vsyncpa [#allocation4 + $0x1], 0  ;;  %s665_s12 = smov 0   ;;  %s667_s13 = smov 0  }
   0x8   :  { %s669_s14 = smov 0   ;;  %s671_s15 = smov 0  }
   0x9 LB: > { %s686_s16 = sadd.s32 4294967295, %s642_s15   ;;  %s395_s17 = sadd.s32 4294967294, %s642_s15   ;;  %s642_s15 = sphi %s671_s15, %s853_s15   ;;  %s638_s14 = sphi %s669_s14, %s852_s14   ;;  %s634_s13 = sphi %s667_s13, %s851_s13   ;;  %s630_s12 = sphi %s665_s12, %s850_s12  }
   0xa   : > { %p42_p0 = scmp.ne.s32.totalorder %s634_s13, %s630_s12  ;;  %p43_p1 = scmp.eq.s32.totalorder %s686_s16, 0 }
   0xb   : > { %p113_p2 = scmp.eq.s32.totalorder %s686_s16, 1  ;;  %p119_p3 = scmp.eq.s32.totalorder %s395_s17, 1 }
   0xc   : > { %p695_p4 = por %p43_p1, %p42_p0  ;;  %p396_p5 = scmp.ge.s32.totalorder %s642_s15, 1 }
   0xd   : > { %p700_p6 = por %p119_p3, %p42_p0  ;;  %p126_p7 = scmp.lt.s32.totalorder %s642_s15, 3 }
   0xe   : > { %s843_s2 = sld [smem:[#allocation14_spill]]  ;;  %s644_s24 = smov [#allocation7]  }
   0xf   : > { %p708_p8 = pnand %p396_p5, %p126_p7  ;;  %s140_s25 = sshll.u32 %s644_s24, 4  ;;  %s141_s25 = int_to_ptr.vmem [resolvable:$true] %s140_s25 }
  0x10   : > { %s718_s26 = sadd.s32 1, %s642_s15   ;;  %s29_s27 = sadd.s32 1, %s638_s14 }
  0x11   : > { %p422_p10 = pneg %p708_p8  ;;  %s26_s28 = ssub.s32 %s642_s15, %s718_s26 }
  0x12   : > { %p27_p12 = scmp.eq.s32.totalorder %s26_s28, 0  ;;  %p36_p13 = scmp.ne.s32.totalorder %s638_s14, %s634_s13 }
  0x13   : > { %p423_p11 = pnand %p422_p10, %p43_p1  ;;  %p37_p0 = scmp.eq.s32.totalorder %s642_s15, 0 }
  0x14   : > { %s138_s22 = sshll.u32 %s843_s2, 4  ;;  %p438_p3 = scmp.lt.s32.totalorder %s642_s15, 2  ;;  %s139_s22 = int_to_ptr.hbm [resolvable:$true] %s138_s22 }
  0x15   : > { %425 = dma.hbm_to_vmem [thread:$0]  (!%p423_p11), %s139_s22, 32, %s141_s25, [#allocation6]  }
  0x16   : > { %s728_s29 = scalar_select %p27_p12, %s638_s14, %s29_s27  }
  0x17   : > { %p38_p5 = por %p37_p0, %p36_p13  ;;  %p732_p7 = por %p113_p2, %p36_p13 }
  0x18   : > { %845 = sst [smem:[#allocation13_spill]] %s728_s29  ;;  %s151_s4 = sand.u32 1, %s638_s14  }
  0x19   : > { %s400_s5 = sshll.u32 %s642_s15, 3  ;;  %s399_s6 = sshll.u32 %s151_s4, 3 }
  0x1a   : > { %s159_s9 = scalar_lea.hbm %s836_s0, %s400_s5  ;;  %s155_s11 = scalar_lea.vmem [#allocation2], %s399_s6 }
  0x1b   : > { %s161_s10 = sshll.u32 %s159_s9, 4  ;;  %s163_s17 = sshll.u32 %s155_s11, 4  ;;  %s162_s10 = int_to_ptr.hbm [resolvable:$true] %s161_s10  ;;  %s164_s17 = int_to_ptr.vmem [resolvable:$true] %s163_s17 }
  0x1c   : > { %p743_p10 = pnand %p438_p3, %p38_p5  ;;  %s178_s24 = scalar_lea.hbm %s837_s1, %s400_s5 }
  0x1d   : > { %s170_s25 = sand.u32 1, %s642_s15   ;;  %s152_s27 = scalar_lea.sflag [#allocation3], %s151_s4 }
  0x1e   : > { %s508_s28 = sshra.s32 %s162_s10, 4  ;;  %p512_p11 = pneg %p743_p10  ;;  %s509_s28 = int_to_ptr.hbm [resolvable:$true] %s508_s28 }
  0x1f   : > { %s510_s7 = scalar_lea.hbm %s509_s28, 8  ;;  %s515_s11 = scalar_lea.hbm %s836_s0, 16 }
  0x20   : > { %p511_p2 = scmp.ne.s32.totalorder %s509_s28, %s510_s7  ;;  %p516_p0 = scmp.lt.s32.totalorder %s509_s28, %s836_s0 }
  0x21   : > { %p517_p3 = scmp.lt.s32.totalorder %s515_s11, %s510_s7 }
  0x22   : > { %p513_p12 = pnand %p512_p11, %p511_p2 }
  0x23   : > { %p518_p5 = por %p517_p3, %p516_p0 }
  0x24   : > { %p514_p13 = pneg %p513_p12 }
  0x26   : > { %p519_p9 = pnand %p518_p5, %p514_p13 }
  0x28   : > { %522 = shalt.err (!%p519_p9)
}
  0x29   : > { %429 = dma.hbm_to_vmem [thread:$0]  (!%p743_p10), %s162_s10, 128, %s164_s17, %s152_s27  }
  0x2a   : > { %s180_s4 = sshll.u32 %s178_s24, 4  ;;  %s174_s5 = scalar_lea.vmem [#allocation5], %s399_s6  ;;  %s181_s4 = int_to_ptr.hbm [resolvable:$true] %s180_s4 }
  0x2b   : > { %s182_s2 = sshll.u32 %s174_s5, 4  ;;  %s171_s29 = scalar_lea.sflag [#allocation6], %s170_s25  ;;  %s183_s2 = int_to_ptr.vmem [resolvable:$true] %s182_s2 }
  0x2c   : > { %s538_s8 = sshra.s32 %s181_s4, 4  ;;  %s545_s11 = scalar_lea.hbm %s837_s1, 16  ;;  %s539_s8 = int_to_ptr.hbm [resolvable:$true] %s538_s8 }
  0x2d   : > { %s540_s9 = scalar_lea.hbm %s539_s8, 8  ;;  %p546_p9 = scmp.lt.s32.totalorder %s539_s8, %s837_s1 }
  0x2e   : > { %p541_p2 = scmp.ne.s32.totalorder %s539_s8, %s540_s9  ;;  %p547_p13 = scmp.lt.s32.totalorder %s545_s11, %s540_s9 }
  0x30   : > { %p543_p12 = pnand %p541_p2, %p512_p11  ;;  %p548_p3 = por %p547_p13, %p546_p9 }
  0x32   : > { %p544_p0 = pneg %p543_p12 }
  0x34   : > { %p549_p5 = pnand %p548_p3, %p544_p0 }
  0x36   : > { %552 = shalt.err (!%p549_p5)
}
  0x37   : > { %432 = dma.hbm_to_vmem [thread:$0]  (!%p743_p10), %s181_s4, 128, %s183_s2, %s171_s29  }
  0x38   : > { %191 = sbr.rel (%p708_p8) target bundleno = 230 (0xe6), region = 32  ;;  %s778_s6 = sand.u32 (!%p708_p8), 1, %s634_s13  }
  0x39   : > { %s781_s17 = sshll.u32 (!%p708_p8), %s778_s6, 3  ;;  %s194_s24 = scalar_lea.sflag (!%p708_p8), [#allocation3], %s778_s6 }
  0x3a   : > { %s197_s25 = scalar_lea.vmem (!%p708_p8), [#allocation2], %s781_s17 }
  0x3d   : > { %613 = dma.done.wait (%p695_p4), %s194_s24, 128  }
  0x3e   : > { %615 = vsyncadd (%p695_p4), %s194_s24, 4294967168  ;;  %s203_s2 = sand.u32 1, %s686_s16   ;;  %s207_s29 = scalar_lea.vmem [#allocation5], %s781_s17 }
  0x3f   : > { %s204_s23 = scalar_lea.sflag [#allocation6], %s203_s2 }
  0x40   : > { %617 = dma.done.wait (%p695_p4), %s204_s23, 128  }
  0x41   : > { %619 = vsyncadd (%p695_p4), %s204_s23, 4294967168 }
  0x42   : > { %621 = dma.done.wait (%p43_p1), [#allocation6], 32  }
  0x43   : > { %623 = vsyncadd (%p43_p1), [#allocation6], 4294967264  ;;  %v241_v0 = vld [vmem:[%s197_s25] sm:$0xff]  ;;  %v242_v1 = vld [vmem:[%s207_s29] sm:$0xff]  ;;  %vm244_vm0 = vcmask 261120   ;;  %s409_s18 = sshll.u32 %s686_s16, 3 }
  0x44   : > { %v243_v2 = vadd.f32 %v242_v1, %v241_v0  ;;  %v474_v21 = vld [vmem:[#allocation7] ss:$0 sm:$0xff]  ;;  %s288_s22 = scalar_lea.hbm %s839_s3, %s409_s18  ;;  %v475_v24 = vld [vmem:[#allocation7 + $0x1] ss:$0 sm:$0xff]  ;;  %s240_s4 = scalar_lea.vmem [#allocation8], %s781_s17 }
  0x45   : > { %s290_s5 = sshll.u32 %s240_s4, 4  ;;  %s292_s8 = sshll.u32 %s288_s22, 4  ;;  %s291_s5 = int_to_ptr.vmem [resolvable:$true] %s290_s5  ;;  %s293_s8 = int_to_ptr.hbm [resolvable:$true] %s292_s8 }
  0x46   : > { %v245_v3 = vsel %vm244_vm0, %v243_v2, 0.0  ;;  %v248_v4 = vmul.f32 %v243_v2, %v243_v2  ;;  %s278_s16 = scalar_lea.sflag [#allocation4], %s778_s6  ;;  %s582_s9 = sshra.s32 %s293_s8, 4  ;;  %s583_s9 = int_to_ptr.hbm [resolvable:$true] %s582_s9 }
  0x47   : > { %246 = vadd.xlane.f32.xlu0 %v245_v3  ;;  %s584_s28 = scalar_lea.hbm %s583_s9, 8  ;;  %s588_s21 = scalar_lea.hbm %s839_s3, 16 }
  0x48   : > { %v249_v5 = vsel %vm244_vm0, %v248_v4, 0.0  ;;  %p585_p1 = scmp.ne.s32.totalorder %s583_s9, %s584_s28  ;;  %p589_p10 = scmp.lt.s32.totalorder %s583_s9, %s839_s3 }
  0x49   : > { %p590_p11 = scmp.lt.s32.totalorder %s588_s21, %s584_s28 }
  0x4a   : > { %p586_p4 = pnand %p585_p1, %p732_p7 }
  0x4b   : > { %p591_p2 = por %p590_p11, %p589_p10 }
  0x4c   : > { %p587_p8 = pneg %p586_p4 }
  0x4e   : > { %p592_p12 = pnand %p591_p2, %p587_p8 }
  0x4f   : > { %250 = vadd.xlane.f32.xlu0 %v249_v5 }
  0xba   : > { %v247_v6 = vpop.xlane.xlu0 %246 }
  0xbb   : > { %v252_v7 = vmul.f32 0.03125, %v247_v6 }
  0xbd   : > { %v254_v9 = vmul.f32 %v252_v7, %v252_v7  ;;  %v270_v20 = vsub.f32 %v243_v2, %v252_v7 }
  0xc2   : > { %v251_v8 = vpop.xlane.xlu0 %250 }
  0xc3   : > { %v253_v10 = vmul.f32 0.03125, %v251_v8 }
  0xc5   : > { %v255_v11 = vsub.f32 %v253_v10, %v254_v9 }
  0xc7   : > { %v256_v12 = vmax.f32 %v255_v11, 0.0 }
  0xc9   : > { %v257_v13 = vadd.f32 1e-05, %v256_v12 }
  0xcb   : > { %476 = vrsqrt.f32 %v257_v13  ;;  %vm264_vm2 = vweird.f32 %v257_v13 }
  0xd1   : > { %v477_v14 = vpop.eup %476 }
  0xd2   : > { %v259_v15 = vmul.f32 %v477_v14, %v257_v13  ;;  %vm265_vm1 = vweird.f32 %v477_v14 }
  0xd3   : > { %vm266_vm3 = vmor %vm264_vm2, %vm265_vm1 }
  0xd4   : > { %v260_v16 = vmul.f32 %v477_v14, %v259_v15 }
  0xd6   : > { %v261_v17 = vmul.f32 0.5, %v260_v16 }
  0xd8   : > { %v262_v18 = vsub.f32 1.5, %v261_v17 }
  0xda   : > { %v263_v19 = vmul.f32 %v477_v14, %v262_v18 }
  0xdc   : > { %v267_v22 = vsel %vm266_vm3, %v477_v14, %v263_v19 }
  0xdd   : > { %v271_v23 = vmul.f32 %v270_v20, %v267_v22 }
  0xdf   : > { %v273_v25 = vmul.f32 %v474_v21, %v271_v23 }
  0xe1   : > { %v275_v26 = vadd.f32 %v475_v24, %v273_v25 }
  0xe3   : > { %276 = vst.msk [vmem:[%s240_s4] sm:$0xff] %vm244_vm0, %v275_v26 }
  0xe4   : > { %595 = shalt.err (!%p592_p12)
}
  0xe5   : > { %420 = dma.vmem_to_hbm [thread:$0]  (%p732_p7), %s291_s5, 128, %s293_s8, %s278_s16  }
  0xe6 PF: > { %s304_s6 = sand.u32 1, %s630_s12   ;;  %p848_p0 = scmp.ge.s32.totalorder %s642_s15, 2 }
  0xe7   : > { %s305_s24 = scalar_lea.sflag [#allocation4], %s304_s6 }
  0xe8   : > { %p434_p9 = pnand %p848_p0, %p700_p6 }
  0xea   : > { %p435_p13 = pneg %p434_p9 }
  0xec   : > { %625 = dma.done.wait (%p435_p13), %s305_s24, 128  }
  0xed   : > { %627 = vsyncadd (%p435_p13), %s305_s24, 4294967168  ;;  %s849_s25 = sld [smem:[#allocation13_spill]]  ;;  %p19_p3 = scmp.ge.s32.totalorder %s718_s26, 4  }
  0xee   : > { %s850_s12 = smov %s634_s13  ;;  %s851_s13 = smov %s638_s14 }
  0xef   : > { %s853_s15 = smov %s718_s26  ;;  %21 = sbr.rel (!%p19_p3) target bundleno = 9 (0x9), region = 94 }
  0xf3   : > { %s852_s14 = smov %s849_s25 }
  0xf4   :  { %311 = vsyncpa [#allocation3], 1 }
  0xf5   :  { %313 = vsyncpa [#allocation3 + $0x1], 1 }
  0xf6   :  { %314 = vsyncpa [#allocation6], 1 }
  0xf7   :  { %316 = vsyncpa [#allocation6 + $0x1], 1 }
  0xf8   :  { %317 = vsyncpa [#allocation4], 1 }
  0xf9   :  { %319 = vsyncpa [#allocation4 + $0x1], 1 }

</bundles_post_ra>
